<compile_context>
chip_gen: v5e
topology: v5e:2x2
jax: 0.10.0
libtpu: 0.0.40
codegen_flags: <defaults>
</compile_context>

<pallas_src>
import jax
import jax.numpy as jnp
from jax.experimental import pallas as pl
from jax.experimental.pallas import tpu as pltpu


def _round_up(n, m):
    return ((n + m - 1) // m) * m


def linear_kernel(x_ref, w_ref, b_ref, o_ref):
    # x_ref: (TB, H), w_ref: (H, O), b_ref: (1, O) f32, o_ref: (TB, O)
    acc = jnp.dot(x_ref[...], w_ref[...], preferred_element_type=jnp.float32)
    o_ref[...] = (acc + b_ref[...]).astype(o_ref.dtype)


def classifier_forward(x, w_t, b, *, tb_cap=4096, min_pallas_batch=256,
                       use_pallas=None):
    """Pallas implementation of Classifier.forward (single nn.Linear).

    x:   (B, hidden_size)
    w_t: (hidden_size, output_size) — transposed PyTorch weight
    b:   (output_size,)
    """
    B, H = x.shape
    O = w_t.shape[1]

    if use_pallas is None:
        use_pallas = B >= min_pallas_batch
    if not use_pallas:
        # Tiny batch: XLA fuses this into neighbours; Pallas launch/pipeline
        # overhead would dominate the ~2*B*H*O flops of useful work.
        acc = jnp.dot(x, w_t.astype(x.dtype), preferred_element_type=jnp.float32)
        return (acc + b.astype(jnp.float32)).astype(x.dtype)

    itemsize = jnp.dtype(x.dtype).itemsize
    # Sublane packing: 8 rows for 32-bit, 16 for 16-bit, 32 for 8-bit dtypes.
    sub = max(8, 32 // itemsize)

    # Batch tile: multiple of the sublane packing, capped for VMEM.
    TB = min(tb_cap, _round_up(B, sub))
    # v7x megacore: once there is enough work, guarantee >= 2 grid steps so the
    # "parallel" batch axis shards across both TensorCores.
    if B >= 2048 and pl.cdiv(B, TB) < 2:
        TB = _round_up((B + 1) // 2, sub)

    grid = (pl.cdiv(B, TB),)

    w_c = w_t.astype(x.dtype)                       # (H, O), tiny, VMEM-resident
    b_2d = b.reshape(1, O).astype(jnp.float32)      # keep bias in f32

    cost = pl.CostEstimate(
        flops=2 * B * H * O,
        transcendentals=0,
        bytes_accessed=(B * H + H * O) * itemsize + O * 4 + B * O * itemsize,
    )

    out = pl.pallas_call(
        linear_kernel,
        out_shape=jax.ShapeDtypeStruct((B, O), x.dtype),
        grid=grid,
        in_specs=[
            pl.BlockSpec((TB, H), lambda i: (i, 0)),   # x: tile over batch (ragged tail OK)
            pl.BlockSpec((H, O), lambda i: (0, 0)),    # weight: VMEM-resident
            pl.BlockSpec((1, O), lambda i: (0, 0)),    # bias (f32): VMEM-resident
        ],
        out_specs=pl.BlockSpec((TB, O), lambda i: (i, 0)),  # narrow, contiguous writeback
        compiler_params=pltpu.CompilerParams(
            dimension_semantics=("parallel",),
        ),
        cost_estimate=cost,
    )(x, w_c, b_2d)

    return out


def make_params(key, hidden_size=256, output_size=7):
    # Deterministic synthetic init mirroring nn.Linear default (uniform in
    # +/- 1/sqrt(fan_in)); shapes from Classifier.__init__ with input_size=368.
    kw, kb = jax.random.split(key)
    bound = 1.0 / (hidden_size ** 0.5)
    w = jax.random.uniform(kw, (output_size, hidden_size), jnp.float32, -bound, bound)
    b = jax.random.uniform(kb, (output_size,), jnp.float32, -bound, bound)
    return w, b


if __name__ == "__main__":
    key = jax.random.PRNGKey(0)
    kx1, kx2, kp = jax.random.split(key, 3)

    hidden_size = 256   # Classifier(input_size=368) -> hidden_size=256
    output_size = 7

    w, b = make_params(kp, hidden_size, output_size)

    # 1) Small batch (B=2) as in the module's typical use: auto XLA fallback.
    x_small = jax.random.normal(kx1, (2, hidden_size), jnp.float32)
    out_small = jax.block_until_ready(classifier_forward(x_small, w.T, b))
    ref_small = x_small @ w.T + b
    assert out_small.shape == (2, output_size)
    assert jnp.allclose(out_small, ref_small, atol=1e-5, rtol=1e-5)

    # 2) Ragged batch (B=300, not a multiple of 8): exercises the Pallas kernel
    #    with a ragged trailing block, no wrapper padding, narrow (B, 7) output.
    x_big = jax.random.normal(kx2, (300, hidden_size), jnp.float32)
    out_big = jax.block_until_ready(
        classifier_forward(x_big, w.T, b, use_pallas=True))
    ref_big = x_big @ w.T + b
    assert out_big.shape == (300, output_size)
    assert jnp.allclose(out_big, ref_big, atol=1e-4, rtol=1e-4)

    print("KERNEL_OK")
</pallas_src>

<mosaic_0001>
module attributes {stable_mosaic.version = 11 : i64} {
  func.func @linear_kernel(%arg0: i32, %arg1: memref<304x256xf32, #tpu.memory_space<vmem>>, %arg2: memref<256x7xf32, #tpu.memory_space<vmem>>, %arg3: memref<1x7xf32, #tpu.memory_space<vmem>>, %arg4: memref<304x7xf32, #tpu.memory_space<vmem>>) attributes {dimension_semantics = [#tpu.dimension_semantics<parallel>], iteration_bounds = array<i64: 1>, scalar_prefetch = 0 : i64, scratch_operands = 0 : i64, tpu.core_type = #tpu.core_type<tc>, window_params = [{transform_indices = @transform_0, window_bounds = array<i64: 304, 256>}, {pipeline_mode = #tpu.pipeline_mode<synchronous>, transform_indices = @transform_1, window_bounds = array<i64: 256, 7>}, {pipeline_mode = #tpu.pipeline_mode<synchronous>, transform_indices = @transform_2, window_bounds = array<i64: 1, 7>}, {transform_indices = @transform_3, window_bounds = array<i64: 304, 7>}]} {
    %c0 = arith.constant 0 : index
    %c0_0 = arith.constant 0 : index
    %0 = vector.load %arg1[%c0, %c0_0] : memref<304x256xf32, #tpu.memory_space<vmem>>, vector<304x256xf32>
    %c0_1 = arith.constant 0 : index
    %c0_2 = arith.constant 0 : index
    %1 = vector.load %arg2[%c0_1, %c0_2] : memref<256x7xf32, #tpu.memory_space<vmem>>, vector<256x7xf32>
    %cst = arith.constant dense<0.000000e+00> : vector<304x7xf32>
    %2 = tpu.matmul %0, %1, %cst {dimension_numbers = #tpu.dot_dimension_numbers<[1], [0], [0], [1], [0, 0, 1, 1], [], []>} : vector<304x256xf32>, vector<256x7xf32>, vector<304x7xf32> -> vector<304x7xf32>
    %c0_3 = arith.constant 0 : index
    %c0_4 = arith.constant 0 : index
    %3 = vector.load %arg3[%c0_3, %c0_4] : memref<1x7xf32, #tpu.memory_space<vmem>>, vector<1x7xf32>
    %4 = vector.broadcast %3 : vector<1x7xf32> to vector<304x7xf32>
    %5 = arith.addf %2, %4 : vector<304x7xf32>
    %c0_5 = arith.constant 0 : index
    %c0_6 = arith.constant 0 : index
    %6 = vector.load %arg4[%c0_5, %c0_6] : memref<304x7xf32, #tpu.memory_space<vmem>>, vector<304x7xf32>
    tpu.vector_store %arg4[%c0_5, %c0_6], %5 {strides = array<i32>} : memref<304x7xf32, #tpu.memory_space<vmem>>, vector<304x7xf32>,
    return
  }
  func.func @transform_0(%arg0: i32) -> (i32, i32) {
    %c0_i32 = arith.constant 0 : i32
    %c0_i32_0 = arith.constant 0 : i32
    return %arg0, %c0_i32 : i32, i32
  }
  func.func @transform_1(%arg0: i32) -> (i32, i32) {
    %c0_i32 = arith.constant 0 : i32
    %c0_i32_0 = arith.constant 0 : i32
    %c0_i32_1 = arith.constant 0 : i32
    return %c0_i32, %c0_i32_0 : i32, i32
  }
  func.func @transform_2(%arg0: i32) -> (i32, i32) {
    %c0_i32 = arith.constant 0 : i32
    %c0_i32_0 = arith.constant 0 : i32
    %c0_i32_1 = arith.constant 0 : i32
    return %c0_i32, %c0_i32_0 : i32, i32
  }
  func.func @transform_3(%arg0: i32) -> (i32, i32) {
    %c0_i32 = arith.constant 0 : i32
    %c0_i32_0 = arith.constant 0 : i32
    return %arg0, %c0_i32 : i32, i32
  }
}

</mosaic_0001>

<bundles_post_ra>
// kernel: tpu_custom_call.1
= control target key start
LH: loop header
LB: loop body
LE: loop exit
PB: predicated region body
PF: predicated region fallthrough
CT: control target
= control target key end

     0   :  { %8 = vsyncpa [#allocation3], 0  ;;  %s510_s15 = smov [#allocation2]   ;;  %s511_s17 = smov 256   ;;  %s827_s0 = inlined_call_operand.hbm [shape: f32[300,256], index: 0, kind: input, shape index: {}]   ;;  %s828_s1 = inlined_call_operand.vmem [shape: f32[256,7], index: 1, kind: input, shape index: {}]   ;;  %s829_s2 = inlined_call_operand.vmem [shape: f32[1,7], index: 2, kind: input, shape index: {}]   ;;  %s830_s3 = inlined_call_operand.vmem [shape: f32[300,7], index: 3, kind: output, shape index: {}]  }
   0x1   :  { %s13_s14 = sshll.u32 %s827_s0, 4  ;;  %s15_s16 = sshll.u32 %s510_s15, 4  ;;  %s14_s14 = int_to_ptr.hbm [resolvable:$true] %s13_s14  ;;  %s16_s16 = int_to_ptr.vmem [resolvable:$true] %s15_s16 }
   0x2   :  { %s512_s18 = smov 16  }
   0x3   :  { %21 = dma.hbm_to_vmem [thread:$0]  %s14_s14, 9728, %s16_s16, [#allocation3], %s511_s17, %s511_s17, %s512_s18  }
   0x4   :  { %508 = dma.done.wait [#allocation3], 9728  }
   0x5   :  { %509 = vsyncadd [#allocation3], 4294957568  ;;  %v121_v0 = vld [vmem:[%s828_s1 + $0x78] sm:$0xff]  ;;  %v120_v1 = vld [vmem:[%s828_s1 + $0x70] sm:$0xff]  ;;  %vm404_vm0 = vcmask 56320  }
   0x6   :  { %v137_v2 = vld [vmem:[%s828_s1 + $0xf8] sm:$0xff]  ;;  %448 = vmatpush.msra.mxu2 %v121_v0  ;;  %v136_v3 = vld [vmem:[%s828_s1 + $0xf0] sm:$0xff]  ;;  %v119_v4 = vld [vmem:[%s828_s1 + $0x68] sm:$0xff]  ;;  %142 = vmatpush.msra.mxu0 %v121_v0 }
   0x7   :  { %464 = vmatpush.msra.mxu3 %v137_v2  ;;  %v135_v5 = vld [vmem:[%s828_s1 + $0xe8] sm:$0xff]  ;;  %273 = vmatpush.msra.mxu1 %v137_v2  ;;  %v118_v6 = vld [vmem:[%s828_s1 + $0x60] sm:$0xff]  ;;  %v117_v8 = vld [vmem:[%s828_s1 + $0x58] sm:$0xff] }
   0x8   :  { %449 = vmatpush.msra.mxu2 %v120_v1  ;;  %143 = vmatpush.msra.mxu0 %v120_v1  ;;  %v134_v7 = vld [vmem:[%s828_s1 + $0xe0] sm:$0xff]  ;;  %v133_v9 = vld [vmem:[%s828_s1 + $0xd8] sm:$0xff]  ;;  %v116_v10 = vld [vmem:[%s828_s1 + $0x50] sm:$0xff] }
   0x9   :  { %465 = vmatpush.msra.mxu3 %v136_v3  ;;  %274 = vmatpush.msra.mxu1 %v136_v3  ;;  %v132_v11 = vld [vmem:[%s828_s1 + $0xd0] sm:$0xff]  ;;  %v115_v12 = vld [vmem:[%s828_s1 + $0x48] sm:$0xff]  ;;  %v114_v14 = vld [vmem:[%s828_s1 + $0x40] sm:$0xff] }
   0xa   :  { %450 = vmatpush.msra.mxu2 %v119_v4  ;;  %144 = vmatpush.msra.mxu0 %v119_v4  ;;  %v131_v13 = vld [vmem:[%s828_s1 + $0xc8] sm:$0xff]  ;;  %v130_v15 = vld [vmem:[%s828_s1 + $0xc0] sm:$0xff]  ;;  %v113_v16 = vld [vmem:[%s828_s1 + $0x38] sm:$0xff] }
   0xb   :  { %466 = vmatpush.msra.mxu3 %v135_v5  ;;  %275 = vmatpush.msra.mxu1 %v135_v5  ;;  %v129_v17 = vld [vmem:[%s828_s1 + $0xb8] sm:$0xff]  ;;  %v112_v18 = vld [vmem:[%s828_s1 + $0x30] sm:$0xff]  ;;  %v111_v20 = vld [vmem:[%s828_s1 + $0x28] sm:$0xff] }
   0xc   :  { %451 = vmatpush.msra.mxu2 %v118_v6  ;;  %145 = vmatpush.msra.mxu0 %v118_v6  ;;  %v128_v19 = vld [vmem:[%s828_s1 + $0xb0] sm:$0xff]  ;;  %v127_v21 = vld [vmem:[%s828_s1 + $0xa8] sm:$0xff]  ;;  %v110_v22 = vld [vmem:[%s828_s1 + $0x20] sm:$0xff] }
   0xd   :  { %467 = vmatpush.msra.mxu3 %v134_v7  ;;  %276 = vmatpush.msra.mxu1 %v134_v7  ;;  %v126_v23 = vld [vmem:[%s828_s1 + $0xa0] sm:$0xff]  ;;  %v109_v24 = vld [vmem:[%s828_s1 + $0x18] sm:$0xff]  ;;  %v108_v26 = vld [vmem:[%s828_s1 + $0x10] sm:$0xff] }
   0xe   :  { %452 = vmatpush.msra.mxu2 %v117_v8  ;;  %146 = vmatpush.msra.mxu0 %v117_v8  ;;  %v125_v25 = vld [vmem:[%s828_s1 + $0x98] sm:$0xff]  ;;  %v124_v27 = vld [vmem:[%s828_s1 + $0x90] sm:$0xff]  ;;  %v107_v28 = vld [vmem:[%s828_s1 + $0x8] sm:$0xff] }
   0xf   :  { %468 = vmatpush.msra.mxu3 %v133_v9  ;;  %277 = vmatpush.msra.mxu1 %v133_v9  ;;  %v123_v29 = vld [vmem:[%s828_s1 + $0x88] sm:$0xff]  ;;  %v106_v30 = vld [vmem:[%s828_s1] sm:$0xff]  ;;  %v68_v32 = vld [vmem:[#allocation2 + $0x130] sm:$0xff] }
  0x10   :  { %453 = vmatpush.msra.mxu2 %v116_v10  ;;  %147 = vmatpush.msra.mxu0 %v116_v10  ;;  %v122_v31 = vld [vmem:[%s828_s1 + $0x80] sm:$0xff]  ;;  %v69_v33 = vld [vmem:[#allocation2 + $0x138] sm:$0xff]  ;;  %v31_v35 = vld [vmem:[#allocation2 + $0x8] sm:$0xff] }
  0x11   :  { %469 = vmatpush.msra.mxu3 %v132_v11  ;;  %278 = vmatpush.msra.mxu1 %v132_v11  ;;  %v30_v34 = vld [vmem:[#allocation2] sm:$0xff]  ;;  %v71_v37 = vld [vmem:[#allocation2 + $0x148] sm:$0xff]  ;;  %v32_v38 = vld [vmem:[#allocation2 + $0x10] sm:$0xff] }
  0x12   :  { %454 = vmatpush.msra.mxu2 %v115_v12  ;;  %148 = vmatpush.msra.mxu0 %v115_v12  ;;  %v70_v36 = vld [vmem:[#allocation2 + $0x140] sm:$0xff]  ;;  %v33_v39 = vld [vmem:[#allocation2 + $0x18] sm:$0xff]  ;;  %v72_v40 = vld [vmem:[#allocation2 + $0x150] sm:$0xff] }
  0x13   :  { %470 = vmatpush.msra.mxu3 %v131_v13  ;;  %279 = vmatpush.msra.mxu1 %v131_v13  ;;  %v73_v41 = vld [vmem:[#allocation2 + $0x158] sm:$0xff]  ;;  %v34_v42 = vld [vmem:[#allocation2 + $0x20] sm:$0xff]  ;;  %v35_v43 = vld [vmem:[#allocation2 + $0x28] sm:$0xff] }
  0x14   :  { %455 = vmatpush.msra.mxu2 %v114_v14  ;;  %149 = vmatpush.msra.mxu0 %v114_v14  ;;  %v74_v44 = vld [vmem:[#allocation2 + $0x160] sm:$0xff]  ;;  %v75_v45 = vld [vmem:[#allocation2 + $0x168] sm:$0xff]  ;;  %v36_v46 = vld [vmem:[#allocation2 + $0x30] sm:$0xff] }
  0x15   :  { %471 = vmatpush.msra.mxu3 %v130_v15  ;;  %280 = vmatpush.msra.mxu1 %v130_v15  ;;  %v37_v47 = vld [vmem:[#allocation2 + $0x38] sm:$0xff]  ;;  %v76_v48 = vld [vmem:[#allocation2 + $0x170] sm:$0xff]  ;;  %v38_v50 = vld [vmem:[#allocation2 + $0x40] sm:$0xff] }
  0x16   :  { %456 = vmatpush.msra.mxu2 %v113_v16  ;;  %150 = vmatpush.msra.mxu0 %v113_v16  ;;  %v77_v49 = vld [vmem:[#allocation2 + $0x178] sm:$0xff]  ;;  %v39_v51 = vld [vmem:[#allocation2 + $0x48] sm:$0xff]  ;;  %v78_v52 = vld [vmem:[#allocation2 + $0x180] sm:$0xff] }
  0x17   :  { %472 = vmatpush.msra.mxu3 %v129_v17  ;;  %281 = vmatpush.msra.mxu1 %v129_v17  ;;  %v79_v53 = vld [vmem:[#allocation2 + $0x188] sm:$0xff]  ;;  %v40_v54 = vld [vmem:[#allocation2 + $0x50] sm:$0xff]  ;;  %v41_v55 = vld [vmem:[#allocation2 + $0x58] sm:$0xff] }
  0x18   :  { %457 = vmatpush.msra.mxu2 %v112_v18  ;;  %151 = vmatpush.msra.mxu0 %v112_v18  ;;  %v80_v56 = vld [vmem:[#allocation2 + $0x190] sm:$0xff]  ;;  %v81_v57 = vld [vmem:[#allocation2 + $0x198] sm:$0xff]  ;;  %v42_v58 = vld [vmem:[#allocation2 + $0x60] sm:$0xff] }
  0x19   :  { %473 = vmatpush.msra.mxu3 %v128_v19  ;;  %282 = vmatpush.msra.mxu1 %v128_v19  ;;  %v43_v59 = vld [vmem:[#allocation2 + $0x68] sm:$0xff]  ;;  %v82_v60 = vld [vmem:[#allocation2 + $0x1a0] sm:$0xff]  ;;  %v44_v62 = vld [vmem:[#allocation2 + $0x70] sm:$0xff] }
  0x1a   :  { %458 = vmatpush.msra.mxu2 %v111_v20  ;;  %152 = vmatpush.msra.mxu0 %v111_v20  ;;  %v83_v61 = vld [vmem:[#allocation2 + $0x1a8] sm:$0xff]  ;;  %v45_v63 = vld [vmem:[#allocation2 + $0x78] sm:$0xff]  ;;  %v84_v0 = vld [vmem:[#allocation2 + $0x1b0] sm:$0xff] }
  0x1b   :  { %474 = vmatpush.msra.mxu3 %v127_v21  ;;  %283 = vmatpush.msra.mxu1 %v127_v21  ;;  %v85_v1 = vld [vmem:[#allocation2 + $0x1b8] sm:$0xff]  ;;  %v46_v2 = vld [vmem:[#allocation2 + $0x80] sm:$0xff]  ;;  %v47_v3 = vld [vmem:[#allocation2 + $0x88] sm:$0xff] }
  0x1c   :  { %459 = vmatpush.msra.mxu2 %v110_v22  ;;  %153 = vmatpush.msra.mxu0 %v110_v22  ;;  %v86_v4 = vld [vmem:[#allocation2 + $0x1c0] sm:$0xff]  ;;  %v87_v5 = vld [vmem:[#allocation2 + $0x1c8] sm:$0xff]  ;;  %v48_v6 = vld [vmem:[#allocation2 + $0x90] sm:$0xff] }
  0x1d   :  { %475 = vmatpush.msra.mxu3 %v126_v23  ;;  %284 = vmatpush.msra.mxu1 %v126_v23  ;;  %v49_v7 = vld [vmem:[#allocation2 + $0x98] sm:$0xff]  ;;  %v88_v8 = vld [vmem:[#allocation2 + $0x1d0] sm:$0xff]  ;;  %v50_v10 = vld [vmem:[#allocation2 + $0xa0] sm:$0xff] }
  0x1e   :  { %460 = vmatpush.msra.mxu2 %v109_v24  ;;  %154 = vmatpush.msra.mxu0 %v109_v24  ;;  %v89_v9 = vld [vmem:[#allocation2 + $0x1d8] sm:$0xff]  ;;  %v51_v11 = vld [vmem:[#allocation2 + $0xa8] sm:$0xff]  ;;  %v90_v12 = vld [vmem:[#allocation2 + $0x1e0] sm:$0xff] }
  0x1f   :  { %476 = vmatpush.msra.mxu3 %v125_v25  ;;  %285 = vmatpush.msra.mxu1 %v125_v25  ;;  %v91_v13 = vld [vmem:[#allocation2 + $0x1e8] sm:$0xff]  ;;  %v52_v14 = vld [vmem:[#allocation2 + $0xb0] sm:$0xff]  ;;  %v53_v15 = vld [vmem:[#allocation2 + $0xb8] sm:$0xff] }
  0x20   :  { %461 = vmatpush.msra.mxu2 %v108_v26  ;;  %155 = vmatpush.msra.mxu0 %v108_v26  ;;  %v92_v16 = vld [vmem:[#allocation2 + $0x1f0] sm:$0xff]  ;;  %v93_v17 = vld [vmem:[#allocation2 + $0x1f8] sm:$0xff]  ;;  %v54_v18 = vld [vmem:[#allocation2 + $0xc0] sm:$0xff] }
  0x21   :  { %477 = vmatpush.msra.mxu3 %v124_v27  ;;  %286 = vmatpush.msra.mxu1 %v124_v27  ;;  %v55_v19 = vld [vmem:[#allocation2 + $0xc8] sm:$0xff]  ;;  %v94_v20 = vld [vmem:[#allocation2 + $0x200] sm:$0xff]  ;;  %v56_v22 = vld [vmem:[#allocation2 + $0xd0] sm:$0xff] }
  0x22   :  { %462 = vmatpush.msra.mxu2 %v107_v28  ;;  %156 = vmatpush.msra.mxu0 %v107_v28  ;;  %v95_v21 = vld [vmem:[#allocation2 + $0x208] sm:$0xff]  ;;  %v57_v23 = vld [vmem:[#allocation2 + $0xd8] sm:$0xff]  ;;  %v96_v24 = vld [vmem:[#allocation2 + $0x210] sm:$0xff] }
  0x23   :  { %478 = vmatpush.msra.mxu3 %v123_v29  ;;  %287 = vmatpush.msra.mxu1 %v123_v29  ;;  %v97_v25 = vld [vmem:[#allocation2 + $0x218] sm:$0xff]  ;;  %v58_v26 = vld [vmem:[#allocation2 + $0xe0] sm:$0xff]  ;;  %v59_v27 = vld [vmem:[#allocation2 + $0xe8] sm:$0xff] }
  0x24   :  { %463 = vmatpush.msra.mxu2 %v106_v30  ;;  %157 = vmatpush.msra.mxu0 %v106_v30  ;;  %v98_v28 = vld [vmem:[#allocation2 + $0x220] sm:$0xff]  ;;  %v99_v29 = vld [vmem:[#allocation2 + $0x228] sm:$0xff]  ;;  %v60_v30 = vld [vmem:[#allocation2 + $0xf0] sm:$0xff] }
  0x25   :  { %479 = vmatpush.msra.mxu3 %v122_v31  ;;  %215 = vmatmul.f32.vlgmr.msra.gmra.mxu2 %v68_v32  ;;  %v635_v32 = vld [vmem:[%s829_s2] ss:$0 sm:$0xff] }
  0x26   :  { %346 = vmatmul.f32.vlgmr.msra.gmra.mxu3 %v69_v33  ;;  %288 = vmatpush.msra.mxu1 %v122_v31  ;;  %v61_v31 = vld [vmem:[#allocation2 + $0xf8] sm:$0xff]  ;;  %v100_v33 = vld [vmem:[#allocation2 + $0x230] sm:$0xff] }
  0x27   :  { %158 = vmatmul.f32.vlgmr.msra.gmra.mxu0 %v30_v34  ;;  %289 = vmatmul.f32.vlgmr.msra.gmra.mxu1 %v31_v35  ;;  %v101_v34 = vld [vmem:[#allocation2 + $0x238] sm:$0xff] }
  0x2d   :  { %218 = vmatmul.f32.gmra.mxu2 %v70_v36 }
  0x2e   :  { %349 = vmatmul.f32.gmra.mxu3 %v71_v37  ;;  %v62_v37 = vld [vmem:[#allocation2 + $0x100] sm:$0xff] }
  0x2f   :  { %161 = vmatmul.f32.gmra.mxu0 %v32_v38  ;;  %292 = vmatmul.f32.gmra.mxu1 %v33_v39  ;;  %v63_v38 = vld [vmem:[#allocation2 + $0x108] sm:$0xff] }
  0x35   :  { %221 = vmatmul.f32.gmra.mxu2 %v72_v40 }
  0x36   :  { %352 = vmatmul.f32.gmra.mxu3 %v73_v41 }
  0x37   :  { %164 = vmatmul.f32.gmra.mxu0 %v34_v42  ;;  %295 = vmatmul.f32.gmra.mxu1 %v35_v43 }
  0x3d   :  { %224 = vmatmul.f32.gmra.mxu2 %v74_v44  ;;  %v102_v44 = vld [vmem:[#allocation2 + $0x240] sm:$0xff] }
  0x3e   :  { %355 = vmatmul.f32.gmra.mxu3 %v75_v45  ;;  %v103_v45 = vld [vmem:[#allocation2 + $0x248] sm:$0xff] }
  0x3f   :  { %167 = vmatmul.f32.gmra.mxu0 %v36_v46  ;;  %298 = vmatmul.f32.gmra.mxu1 %v37_v47 }
  0x45   :  { %227 = vmatmul.f32.gmra.mxu2 %v76_v48 }
  0x46   :  { %358 = vmatmul.f32.gmra.mxu3 %v77_v49  ;;  %v64_v49 = vld [vmem:[#allocation2 + $0x110] sm:$0xff] }
  0x47   :  { %170 = vmatmul.f32.gmra.mxu0 %v38_v50  ;;  %301 = vmatmul.f32.gmra.mxu1 %v39_v51  ;;  %v65_v50 = vld [vmem:[#allocation2 + $0x118] sm:$0xff] }
  0x4d   :  { %230 = vmatmul.f32.gmra.mxu2 %v78_v52 }
  0x4e   :  { %361 = vmatmul.f32.gmra.mxu3 %v79_v53 }
  0x4f   :  { %173 = vmatmul.f32.gmra.mxu0 %v40_v54  ;;  %304 = vmatmul.f32.gmra.mxu1 %v41_v55 }
  0x55   :  { %233 = vmatmul.f32.gmra.mxu2 %v80_v56  ;;  %v104_v56 = vld [vmem:[#allocation2 + $0x250] sm:$0xff] }
  0x56   :  { %364 = vmatmul.f32.gmra.mxu3 %v81_v57  ;;  %v105_v57 = vld [vmem:[#allocation2 + $0x258] sm:$0xff] }
  0x57   :  { %176 = vmatmul.f32.gmra.mxu0 %v42_v58  ;;  %307 = vmatmul.f32.gmra.mxu1 %v43_v59 }
  0x5d   :  { %236 = vmatmul.f32.gmra.mxu2 %v82_v60 }
  0x5e   :  { %367 = vmatmul.f32.gmra.mxu3 %v83_v61  ;;  %v66_v61 = vld [vmem:[#allocation2 + $0x120] sm:$0xff] }
  0x5f   :  { %179 = vmatmul.f32.gmra.mxu0 %v44_v62  ;;  %310 = vmatmul.f32.gmra.mxu1 %v45_v63  ;;  %v67_v62 = vld [vmem:[#allocation2 + $0x128] sm:$0xff] }
  0x65   :  { %239 = vmatmul.f32.gmra.mxu2 %v84_v0 }
  0x66   :  { %370 = vmatmul.f32.gmra.mxu3 %v85_v1 }
  0x67   :  { %182 = vmatmul.f32.gmra.mxu0 %v46_v2  ;;  %313 = vmatmul.f32.gmra.mxu1 %v47_v3 }
  0x6d   :  { %242 = vmatmul.f32.gmra.mxu2 %v86_v4 }
  0x6e   :  { %373 = vmatmul.f32.gmra.mxu3 %v87_v5 }
  0x6f   :  { %185 = vmatmul.f32.gmra.mxu0 %v48_v6  ;;  %316 = vmatmul.f32.gmra.mxu1 %v49_v7 }
  0x75   :  { %245 = vmatmul.f32.gmra.mxu2 %v88_v8 }
  0x76   :  { %376 = vmatmul.f32.gmra.mxu3 %v89_v9 }
  0x77   :  { %188 = vmatmul.f32.gmra.mxu0 %v50_v10  ;;  %319 = vmatmul.f32.gmra.mxu1 %v51_v11 }
  0x7d   :  { %248 = vmatmul.f32.gmra.mxu2 %v90_v12 }
  0x7e   :  { %379 = vmatmul.f32.gmra.mxu3 %v91_v13 }
  0x7f   :  { %191 = vmatmul.f32.gmra.mxu0 %v52_v14  ;;  %322 = vmatmul.f32.gmra.mxu1 %v53_v15 }
  0x85   :  { %251 = vmatmul.f32.gmra.mxu2 %v92_v16 }
  0x86   :  { %382 = vmatmul.f32.gmra.mxu3 %v93_v17 }
  0x87   :  { %194 = vmatmul.f32.gmra.mxu0 %v54_v18  ;;  %325 = vmatmul.f32.gmra.mxu1 %v55_v19 }
  0x8d   :  { %254 = vmatmul.f32.gmra.mxu2 %v94_v20 }
  0x8e   :  { %385 = vmatmul.f32.gmra.mxu3 %v95_v21 }
  0x8f   :  { %197 = vmatmul.f32.gmra.mxu0 %v56_v22  ;;  %328 = vmatmul.f32.gmra.mxu1 %v57_v23 }
  0x95   :  { %257 = vmatmul.f32.gmra.mxu2 %v96_v24 }
  0x96   :  { %388 = vmatmul.f32.gmra.mxu3 %v97_v25 }
  0x97   :  { %200 = vmatmul.f32.gmra.mxu0 %v58_v26  ;;  %331 = vmatmul.f32.gmra.mxu1 %v59_v27 }
  0x9d   :  { %260 = vmatmul.f32.gmra.mxu2 %v98_v28 }
  0x9e   :  { %391 = vmatmul.f32.gmra.mxu3 %v99_v29 }
  0x9f   :  { %203 = vmatmul.f32.gmra.mxu0 %v60_v30  ;;  %334 = vmatmul.f32.gmra.mxu1 %v61_v31 }
  0xa4   :  { %v159_v35 = vpop.f32.mrf.mxu0  ;;  %v290_v36 = vpop.f32.mrf.mxu1 }
  0xa5   :  { %263 = vmatmul.f32.gmra.mxu2 %v100_v33  ;;  %v160_v39 = vadd.f32 %v635_v32, %v159_v35 }
  0xa6   :  { %394 = vmatmul.f32.gmra.mxu3 %v101_v34 }
  0xa7   :  { %v291_v40 = vadd.f32 %v290_v36, %v160_v39  ;;  %206 = vmatmul.f32.gmra.mxu0 %v62_v37  ;;  %337 = vmatmul.f32.gmra.mxu1 %v63_v38 }
  0xa8   :  { %v216_v41 = vpop.f32.mrf.mxu2 }
  0xa9   :  { %v347_v42 = vpop.f32.mrf.mxu3  ;;  %v217_v43 = vadd.f32 %v635_v32, %v216_v41  ;;  %405 = vst.msk [vmem:[%s830_s3] sm:$0xff] %vm404_vm0, %v291_v40 }
  0xab   :  { %v348_v46 = vadd.f32 %v347_v42, %v217_v43 }
  0xac   :  { %v162_v47 = vpop.f32.mrf.mxu0  ;;  %v293_v48 = vpop.f32.mrf.mxu1 }
  0xad   :  { %424 = vst.msk [vmem:[%s830_s3 + $0x98] sm:$0xff] %vm404_vm0, %v348_v46  ;;  %266 = vmatmul.f32.gmra.mxu2 %v102_v44  ;;  %v163_v51 = vadd.f32 %v635_v32, %v162_v47 }
  0xae   :  { %397 = vmatmul.f32.gmra.mxu3 %v103_v45 }
  0xaf   :  { %v294_v52 = vadd.f32 %v293_v48, %v163_v51  ;;  %209 = vmatmul.f32.gmra.mxu0 %v64_v49  ;;  %340 = vmatmul.f32.gmra.mxu1 %v65_v50 }
  0xb0   :  { %v219_v53 = vpop.f32.mrf.mxu2 }
  0xb1   :  { %v350_v54 = vpop.f32.mrf.mxu3  ;;  %v220_v55 = vadd.f32 %v635_v32, %v219_v53  ;;  %406 = vst.msk [vmem:[%s830_s3 + $0x8] sm:$0xff] %vm404_vm0, %v294_v52 }
  0xb3   :  { %v351_v58 = vadd.f32 %v350_v54, %v220_v55 }
  0xb4   :  { %v165_v59 = vpop.f32.mrf.mxu0  ;;  %v296_v60 = vpop.f32.mrf.mxu1 }
  0xb5   :  { %425 = vst.msk [vmem:[%s830_s3 + $0xa0] sm:$0xff] %vm404_vm0, %v351_v58  ;;  %269 = vmatmul.f32.gmra.mxu2 %v104_v56  ;;  %v166_v63 = vadd.f32 %v635_v32, %v165_v59 }
  0xb6   :  { %400 = vmatmul.f32.gmra.mxu3 %v105_v57 }
  0xb7   :  { %v297_v0 = vadd.f32 %v296_v60, %v166_v63  ;;  %212 = vmatmul.f32.gmra.mxu0 %v66_v61  ;;  %343 = vmatmul.f32.gmra.mxu1 %v67_v62 }
  0xb8   :  { %v222_v1 = vpop.f32.mrf.mxu2 }
  0xb9   :  { %v353_v2 = vpop.f32.mrf.mxu3  ;;  %v223_v3 = vadd.f32 %v635_v32, %v222_v1  ;;  %407 = vst.msk [vmem:[%s830_s3 + $0x10] sm:$0xff] %vm404_vm0, %v297_v0 }
  0xbb   :  { %v354_v4 = vadd.f32 %v353_v2, %v223_v3 }
  0xbc   :  { %v168_v5 = vpop.f32.mrf.mxu0  ;;  %v299_v6 = vpop.f32.mrf.mxu1 }
  0xbd   :  { %426 = vst.msk [vmem:[%s830_s3 + $0xa8] sm:$0xff] %vm404_vm0, %v354_v4  ;;  %v169_v7 = vadd.f32 %v635_v32, %v168_v5 }
  0xbf   :  { %v300_v8 = vadd.f32 %v299_v6, %v169_v7 }
  0xc0   :  { %v225_v9 = vpop.f32.mrf.mxu2 }
  0xc1   :  { %v356_v10 = vpop.f32.mrf.mxu3  ;;  %v226_v11 = vadd.f32 %v635_v32, %v225_v9  ;;  %408 = vst.msk [vmem:[%s830_s3 + $0x18] sm:$0xff] %vm404_vm0, %v300_v8 }
  0xc3   :  { %v357_v12 = vadd.f32 %v356_v10, %v226_v11 }
  0xc4   :  { %v171_v13 = vpop.f32.mrf.mxu0  ;;  %v302_v14 = vpop.f32.mrf.mxu1 }
  0xc5   :  { %427 = vst.msk [vmem:[%s830_s3 + $0xb0] sm:$0xff] %vm404_vm0, %v357_v12  ;;  %v172_v15 = vadd.f32 %v635_v32, %v171_v13 }
  0xc7   :  { %v303_v16 = vadd.f32 %v302_v14, %v172_v15 }
  0xc8   :  { %v228_v17 = vpop.f32.mrf.mxu2 }
  0xc9   :  { %v359_v18 = vpop.f32.mrf.mxu3  ;;  %v229_v19 = vadd.f32 %v635_v32, %v228_v17  ;;  %409 = vst.msk [vmem:[%s830_s3 + $0x20] sm:$0xff] %vm404_vm0, %v303_v16 }
  0xcb   :  { %v360_v20 = vadd.f32 %v359_v18, %v229_v19 }
  0xcc   :  { %v174_v21 = vpop.f32.mrf.mxu0  ;;  %v305_v22 = vpop.f32.mrf.mxu1 }
  0xcd   :  { %428 = vst.msk [vmem:[%s830_s3 + $0xb8] sm:$0xff] %vm404_vm0, %v360_v20  ;;  %v175_v23 = vadd.f32 %v635_v32, %v174_v21 }
  0xcf   :  { %v306_v24 = vadd.f32 %v305_v22, %v175_v23 }
  0xd0   :  { %v231_v25 = vpop.f32.mrf.mxu2 }
  0xd1   :  { %v362_v26 = vpop.f32.mrf.mxu3  ;;  %v232_v27 = vadd.f32 %v635_v32, %v231_v25  ;;  %410 = vst.msk [vmem:[%s830_s3 + $0x28] sm:$0xff] %vm404_vm0, %v306_v24 }
  0xd3   :  { %v363_v28 = vadd.f32 %v362_v26, %v232_v27 }
  0xd4   :  { %v177_v29 = vpop.f32.mrf.mxu0  ;;  %v308_v30 = vpop.f32.mrf.mxu1 }
  0xd5   :  { %429 = vst.msk [vmem:[%s830_s3 + $0xc0] sm:$0xff] %vm404_vm0, %v363_v28  ;;  %v178_v31 = vadd.f32 %v635_v32, %v177_v29 }
  0xd7   :  { %v309_v33 = vadd.f32 %v308_v30, %v178_v31 }
  0xd8   :  { %v234_v34 = vpop.f32.mrf.mxu2 }
  0xd9   :  { %v365_v35 = vpop.f32.mrf.mxu3  ;;  %v235_v36 = vadd.f32 %v635_v32, %v234_v34  ;;  %411 = vst.msk [vmem:[%s830_s3 + $0x30] sm:$0xff] %vm404_vm0, %v309_v33 }
  0xdb   :  { %v366_v37 = vadd.f32 %v365_v35, %v235_v36 }
  0xdc   :  { %v180_v38 = vpop.f32.mrf.mxu0  ;;  %v311_v39 = vpop.f32.mrf.mxu1 }
  0xdd   :  { %430 = vst.msk [vmem:[%s830_s3 + $0xc8] sm:$0xff] %vm404_vm0, %v366_v37  ;;  %v181_v40 = vadd.f32 %v635_v32, %v180_v38 }
  0xdf   :  { %v312_v41 = vadd.f32 %v311_v39, %v181_v40 }
  0xe0   :  { %v237_v42 = vpop.f32.mrf.mxu2 }
  0xe1   :  { %v368_v43 = vpop.f32.mrf.mxu3  ;;  %v238_v44 = vadd.f32 %v635_v32, %v237_v42  ;;  %412 = vst.msk [vmem:[%s830_s3 + $0x38] sm:$0xff] %vm404_vm0, %v312_v41 }
  0xe3   :  { %v369_v45 = vadd.f32 %v368_v43, %v238_v44 }
  0xe4   :  { %v183_v46 = vpop.f32.mrf.mxu0  ;;  %v314_v47 = vpop.f32.mrf.mxu1 }
  0xe5   :  { %431 = vst.msk [vmem:[%s830_s3 + $0xd0] sm:$0xff] %vm404_vm0, %v369_v45  ;;  %v184_v48 = vadd.f32 %v635_v32, %v183_v46 }
  0xe7   :  { %v315_v49 = vadd.f32 %v314_v47, %v184_v48 }
  0xe8   :  { %v240_v50 = vpop.f32.mrf.mxu2 }
  0xe9   :  { %v371_v51 = vpop.f32.mrf.mxu3  ;;  %v241_v52 = vadd.f32 %v635_v32, %v240_v50  ;;  %413 = vst.msk [vmem:[%s830_s3 + $0x40] sm:$0xff] %vm404_vm0, %v315_v49 }
  0xeb   :  { %v372_v53 = vadd.f32 %v371_v51, %v241_v52 }
  0xec   :  { %v186_v54 = vpop.f32.mrf.mxu0  ;;  %v317_v55 = vpop.f32.mrf.mxu1 }
  0xed   :  { %432 = vst.msk [vmem:[%s830_s3 + $0xd8] sm:$0xff] %vm404_vm0, %v372_v53  ;;  %v187_v56 = vadd.f32 %v635_v32, %v186_v54 }
  0xef   :  { %v318_v57 = vadd.f32 %v317_v55, %v187_v56 }
  0xf0   :  { %v243_v58 = vpop.f32.mrf.mxu2 }
  0xf1   :  { %v374_v59 = vpop.f32.mrf.mxu3  ;;  %v244_v60 = vadd.f32 %v635_v32, %v243_v58  ;;  %414 = vst.msk [vmem:[%s830_s3 + $0x48] sm:$0xff] %vm404_vm0, %v318_v57 }
  0xf3   :  { %v375_v61 = vadd.f32 %v374_v59, %v244_v60 }
  0xf4   :  { %v189_v62 = vpop.f32.mrf.mxu0  ;;  %v320_v63 = vpop.f32.mrf.mxu1 }
  0xf5   :  { %433 = vst.msk [vmem:[%s830_s3 + $0xe0] sm:$0xff] %vm404_vm0, %v375_v61  ;;  %v190_v0 = vadd.f32 %v635_v32, %v189_v62 }
  0xf7   :  { %v321_v1 = vadd.f32 %v320_v63, %v190_v0 }
  0xf8   :  { %v246_v2 = vpop.f32.mrf.mxu2 }
  0xf9   :  { %v377_v3 = vpop.f32.mrf.mxu3  ;;  %v247_v4 = vadd.f32 %v635_v32, %v246_v2  ;;  %415 = vst.msk [vmem:[%s830_s3 + $0x50] sm:$0xff] %vm404_vm0, %v321_v1 }
  0xfb   :  { %v378_v5 = vadd.f32 %v377_v3, %v247_v4 }
  0xfc   :  { %v192_v6 = vpop.f32.mrf.mxu0  ;;  %v323_v7 = vpop.f32.mrf.mxu1 }
  0xfd   :  { %434 = vst.msk [vmem:[%s830_s3 + $0xe8] sm:$0xff] %vm404_vm0, %v378_v5  ;;  %v193_v8 = vadd.f32 %v635_v32, %v192_v6 }
  0xff   :  { %v324_v9 = vadd.f32 %v323_v7, %v193_v8 }
 0x100   :  { %v249_v10 = vpop.f32.mrf.mxu2 }
 0x101   :  { %v380_v11 = vpop.f32.mrf.mxu3  ;;  %v250_v12 = vadd.f32 %v635_v32, %v249_v10  ;;  %416 = vst.msk [vmem:[%s830_s3 + $0x58] sm:$0xff] %vm404_vm0, %v324_v9 }
 0x103   :  { %v381_v13 = vadd.f32 %v380_v11, %v250_v12 }
 0x104   :  { %v195_v14 = vpop.f32.mrf.mxu0  ;;  %v326_v15 = vpop.f32.mrf.mxu1 }
 0x105   :  { %435 = vst.msk [vmem:[%s830_s3 + $0xf0] sm:$0xff] %vm404_vm0, %v381_v13  ;;  %v196_v16 = vadd.f32 %v635_v32, %v195_v14 }
 0x107   :  { %v327_v17 = vadd.f32 %v326_v15, %v196_v16 }
 0x108   :  { %v252_v18 = vpop.f32.mrf.mxu2 }
 0x109   :  { %v383_v19 = vpop.f32.mrf.mxu3  ;;  %v253_v20 = vadd.f32 %v635_v32, %v252_v18  ;;  %417 = vst.msk [vmem:[%s830_s3 + $0x60] sm:$0xff] %vm404_vm0, %v327_v17 }
 0x10b   :  { %v384_v21 = vadd.f32 %v383_v19, %v253_v20 }
 0x10c   :  { %v198_v22 = vpop.f32.mrf.mxu0  ;;  %v329_v23 = vpop.f32.mrf.mxu1 }
 0x10d   :  { %436 = vst.msk [vmem:[%s830_s3 + $0xf8] sm:$0xff] %vm404_vm0, %v384_v21  ;;  %v199_v24 = vadd.f32 %v635_v32, %v198_v22 }
 0x10f   :  { %v330_v25 = vadd.f32 %v329_v23, %v199_v24 }
 0x110   :  { %v255_v26 = vpop.f32.mrf.mxu2 }
 0x111   :  { %v386_v27 = vpop.f32.mrf.mxu3  ;;  %v256_v28 = vadd.f32 %v635_v32, %v255_v26  ;;  %418 = vst.msk [vmem:[%s830_s3 + $0x68] sm:$0xff] %vm404_vm0, %v330_v25 }
 0x113   :  { %v387_v29 = vadd.f32 %v386_v27, %v256_v28 }
 0x114   :  { %v201_v30 = vpop.f32.mrf.mxu0  ;;  %v332_v31 = vpop.f32.mrf.mxu1 }
 0x115   :  { %437 = vst.msk [vmem:[%s830_s3 + $0x100] sm:$0xff] %vm404_vm0, %v387_v29  ;;  %v202_v33 = vadd.f32 %v635_v32, %v201_v30 }
 0x117   :  { %v333_v34 = vadd.f32 %v332_v31, %v202_v33 }
 0x118   :  { %v258_v35 = vpop.f32.mrf.mxu2 }
 0x119   :  { %v389_v36 = vpop.f32.mrf.mxu3  ;;  %v259_v37 = vadd.f32 %v635_v32, %v258_v35  ;;  %419 = vst.msk [vmem:[%s830_s3 + $0x70] sm:$0xff] %vm404_vm0, %v333_v34 }
 0x11b   :  { %v390_v38 = vadd.f32 %v389_v36, %v259_v37 }
 0x11c   :  { %v204_v39 = vpop.f32.mrf.mxu0  ;;  %v335_v40 = vpop.f32.mrf.mxu1 }
 0x11d   :  { %438 = vst.msk [vmem:[%s830_s3 + $0x108] sm:$0xff] %vm404_vm0, %v390_v38  ;;  %v205_v41 = vadd.f32 %v635_v32, %v204_v39 }
 0x11f   :  { %v336_v42 = vadd.f32 %v335_v40, %v205_v41 }
 0x120   :  { %v261_v43 = vpop.f32.mrf.mxu2 }
 0x121   :  { %v392_v44 = vpop.f32.mrf.mxu3  ;;  %v262_v45 = vadd.f32 %v635_v32, %v261_v43  ;;  %420 = vst.msk [vmem:[%s830_s3 + $0x78] sm:$0xff] %vm404_vm0, %v336_v42 }
 0x123   :  { %v393_v46 = vadd.f32 %v392_v44, %v262_v45 }
 0x124   :  { %v207_v47 = vpop.f32.mrf.mxu0  ;;  %v338_v48 = vpop.f32.mrf.mxu1 }
 0x125   :  { %439 = vst.msk [vmem:[%s830_s3 + $0x110] sm:$0xff] %vm404_vm0, %v393_v46  ;;  %v208_v49 = vadd.f32 %v635_v32, %v207_v47 }
 0x127   :  { %v339_v50 = vadd.f32 %v338_v48, %v208_v49 }
 0x128   :  { %v264_v51 = vpop.f32.mrf.mxu2 }
 0x129   :  { %v395_v52 = vpop.f32.mrf.mxu3  ;;  %v265_v53 = vadd.f32 %v635_v32, %v264_v51  ;;  %421 = vst.msk [vmem:[%s830_s3 + $0x80] sm:$0xff] %vm404_vm0, %v339_v50 }
 0x12b   :  { %v396_v54 = vadd.f32 %v395_v52, %v265_v53 }
 0x12c   :  { %v210_v55 = vpop.f32.mrf.mxu0  ;;  %v341_v56 = vpop.f32.mrf.mxu1 }
 0x12d   :  { %440 = vst.msk [vmem:[%s830_s3 + $0x118] sm:$0xff] %vm404_vm0, %v396_v54  ;;  %v211_v57 = vadd.f32 %v635_v32, %v210_v55 }
 0x12f   :  { %v342_v58 = vadd.f32 %v341_v56, %v211_v57 }
 0x130   :  { %v267_v59 = vpop.f32.mrf.mxu2 }
 0x131   :  { %v398_v60 = vpop.f32.mrf.mxu3  ;;  %v268_v61 = vadd.f32 %v635_v32, %v267_v59  ;;  %422 = vst.msk [vmem:[%s830_s3 + $0x88] sm:$0xff] %vm404_vm0, %v342_v58 }
 0x133   :  { %v399_v62 = vadd.f32 %v398_v60, %v268_v61 }
 0x134   :  { %v213_v63 = vpop.f32.mrf.mxu0  ;;  %v344_v0 = vpop.f32.mrf.mxu1 }
 0x135   :  { %441 = vst.msk [vmem:[%s830_s3 + $0x120] sm:$0xff] %vm404_vm0, %v399_v62  ;;  %v214_v1 = vadd.f32 %v635_v32, %v213_v63 }
 0x137   :  { %v345_v2 = vadd.f32 %v344_v0, %v214_v1 }
 0x138   :  { %v270_v3 = vpop.f32.mrf.mxu2 }
 0x139   :  { %v401_v4 = vpop.f32.mrf.mxu3  ;;  %v271_v5 = vadd.f32 %v635_v32, %v270_v3  ;;  %423 = vst.msk [vmem:[%s830_s3 + $0x90] sm:$0xff] %vm404_vm0, %v345_v2 }
 0x13b   :  { %v402_v6 = vadd.f32 %v401_v4, %v271_v5 }
 0x13d   :  { %442 = vst.msk [vmem:[%s830_s3 + $0x128] sm:$0xff] %vm404_vm0, %v402_v6 }
 0x13e   :  { %447 = vsyncpa [#allocation3], 1 }

</bundles_post_ra>
